<compile_context>
chip_gen: v6e
topology: v6e:2x2x1
jax: 0.10.0
libtpu: 0.0.40
codegen_flags: <defaults>
</compile_context>

<pallas_src>
import jax
import jax.numpy as jnp
import numpy as np
from jax import lax
from jax.experimental import pallas as pl
from jax.experimental.pallas import tpu as pltpu


_LANE_BYTES = 128 * 4     # one lane-padded f32 row in VMEM (last dim < 128 pads to 128 lanes)
_IN_BUFFERS = 3           # pl.Buffered(3) on the narrow patches DMA (when grid is deep enough)
_OUT_BUFFERS = 2          # default double-buffered output
_NUM_BUFFERS = _IN_BUFFERS + _OUT_BUFFERS


def _round_up(x, m):
    return (x + m - 1) // m * m


def _physical_vmem_bytes():
    """Per-core VMEM capacity; falls back to the smallest (v7x: 64 MiB) when unknown."""
    try:
        info = pltpu.get_tpu_info()
        v = getattr(info, "vmem_capacity_bytes", None)
        if v:
            return int(v)
    except Exception:
        pass
    return 64 * 1024 * 1024


def _choose_tile_m(M, vmem_budget_bytes, *, target_steps=8):
    """Pick the row tile TM.

    VMEM cost per TM row is _NUM_BUFFERS * 512 B: the (TM,3) and (TM,50) blocks both
    lane-pad to 128, so the padding -- not the 12/200 B of real data -- sets the budget.
    Take the largest TM under the budget, keep >= target_steps grid steps for large
    problems (megacore sharding on v7x + pipeline overlap), and don't let the per-step
    payload collapse below ~2K rows (~400 KB writeback) so the ~0.35 us fixed per-step
    cost stays amortized.
    """
    tm_cap = max(8, (vmem_budget_bytes // (_NUM_BUFFERS * _LANE_BYTES)) // 8 * 8)
    tm = min(tm_cap, _round_up(pl.cdiv(M, target_steps), 8))
    tm = max(tm, min(2048, _round_up(M, 8)))
    return min(tm, tm_cap)


def _conv_embed_kernel(patches_ref, w_ref, b_ref, o_ref):
    # patches: (TM, K) rows of B*L_out, K = C_in*ksize
    # w:       (K, N)  N = embedding_c
    # b:       (1, N)
    # K=3, N=50 is MXU-degenerate and the kernel is HBM-store bound everywhere, so a
    # single dot + bias + ReLU is all the compute we want (no per-tap VPU formulation).
    acc = jnp.dot(patches_ref[...], w_ref[...], preferred_element_type=jnp.float32)
    acc = acc + b_ref[...]
    o_ref[...] = jnp.maximum(acc, 0.0).astype(o_ref.dtype)


def _build_patches(x, kernel_size, stride, padding):
    """(B, C_in, L) -> ((B*L_out, C_in*K), L_out).

    Single pad pass; no gather when stride == kernel_size (non-overlapping windows are a
    pure reshape of the padded input)."""
    B, C_in, L = x.shape
    L_pad = L + 2 * padding
    L_out = (L_pad - kernel_size) // stride + 1
    if stride == kernel_size:
        need = L_out * kernel_size                    # <= L_pad
        right = need - padding - L
        if right >= 0:
            x_p = jnp.pad(x, ((0, 0), (0, 0), (padding, right)))
        else:
            x_p = jnp.pad(x, ((0, 0), (0, 0), (padding, 0)))[:, :, :need]
        p = x_p.reshape(B, C_in, L_out, kernel_size)
    else:
        # Fallback (overlap != 0): gather-based im2col (K-fold HBM duplication; not the
        # hot path for this module's defaults).
        x_p = jnp.pad(x, ((0, 0), (0, 0), (padding, padding)))
        idx = jnp.arange(L_out)[:, None] * stride + jnp.arange(kernel_size)[None, :]
        p = x_p[:, :, idx]                            # (B, C_in, L_out, K)
    p = jnp.transpose(p, (0, 2, 1, 3))                # (B, L_out, C_in, K); no-op for C_in==1
    return p.reshape(B * L_out, C_in * kernel_size), L_out


def embedding_forward(x, weight, bias, *, kernel_size=3, stride=3, padding=1, tile_m=None):
    """x: (B, C_in, L) float32; weight: (out_c, C_in, K); bias: (out_c,)
    Returns (B, L_out, out_c)  (== PyTorch forward's permuted output)."""
    B, C_in, L = x.shape
    out_c = weight.shape[0]

    patches, L_out = _build_patches(x, kernel_size, stride, padding)
    M, Kc = patches.shape
    N = out_c

    w_mat = weight.reshape(out_c, Kc).T               # (C_in*K, out_c)
    b_row = bias.reshape(1, out_c)

    # --- tile selection from lane-padded VMEM budget (safe on v7x's 64 MiB/core) ---
    vmem_budget = min(int(_physical_vmem_bytes() * 0.55), 48 * 1024 * 1024)
    TM = int(tile_m) if tile_m is not None else _choose_tile_m(M, vmem_budget)
    TM = max(8, _round_up(TM, 8))
    num_steps = pl.cdiv(M, TM)          # ragged last block is masked by Pallas (no M pad pass)
    grid = (num_steps,)

    # The (TM,3) input DMA writes 12 real bytes per 512 B sublane pitch and can leak out
    # from under the pipeline; deepen its pipeline when the grid is long enough to benefit.
    if num_steps >= 3:
        patch_spec = pl.BlockSpec((TM, Kc), lambda i: (i, 0),
                                  pipeline_mode=pl.Buffered(_IN_BUFFERS))
    else:
        patch_spec = pl.BlockSpec((TM, Kc), lambda i: (i, 0))

    # Scoped VMEM must cover the lane-padded, multi-buffered blocks (+ headroom).
    vmem_limit = max(int(_NUM_BUFFERS * TM * _LANE_BYTES) + (4 << 20), 16 << 20)

    cost = pl.CostEstimate(
        flops=2 * M * Kc * N,
        transcendentals=0,
        bytes_accessed=(M * Kc + Kc * N + N + M * N) * 4,
    )

    out = pl.pallas_call(
        _conv_embed_kernel,
        out_shape=jax.ShapeDtypeStruct((M, N), x.dtype),
        grid=grid,
        in_specs=[
            patch_spec,                                 # row tile of patches
            pl.BlockSpec((Kc, N), lambda i: (0, 0)),    # weights resident
            pl.BlockSpec((1, N), lambda i: (0, 0)),     # bias resident
        ],
        out_specs=pl.BlockSpec((TM, N), lambda i: (i, 0)),
        compiler_params=pltpu.CompilerParams(
            dimension_semantics=("parallel",),          # megacore-shard row tiles (v7x)
            vmem_limit_bytes=vmem_limit,
        ),
        cost_estimate=cost,
    )(patches, w_mat, b_row)

    return out.reshape(B, L_out, out_c)


def _reference_forward(x, weight, bias, *, stride=3, padding=1):
    # Pure-JAX reference mirroring PyTorch Conv1d + ReLU + permute(0,2,1).
    y = lax.conv_general_dilated(
        x, weight,
        window_strides=(stride,),
        padding=[(padding, padding)],
        dimension_numbers=("NCH", "OIH", "NCH"),
    )
    y = y + bias[None, :, None]
    y = jnp.maximum(y, 0.0)
    return jnp.transpose(y, (0, 2, 1))


if __name__ == "__main__":
    key = jax.random.PRNGKey(0)
    k_x, k_w, k_b, k_x2 = jax.random.split(key, 4)

    # Module hyperparams (defaults from __init__)
    input_channel, embedding_c, kernel_size, overlap, padding = 1, 50, 3, 0, 1
    stride = kernel_size - overlap

    fan_in = input_channel * kernel_size
    bound = 1.0 / np.sqrt(fan_in)
    weight = jax.random.uniform(k_w, (embedding_c, input_channel, kernel_size),
                                minval=-bound, maxval=bound, dtype=jnp.float32)
    bias = jax.random.uniform(k_b, (embedding_c,),
                              minval=-bound, maxval=bound, dtype=jnp.float32)

    # Case 1: small shape consistent with the module (single-step grid, partial block).
    B, L = 2, 16
    x = jax.random.normal(k_x, (B, input_channel, L), dtype=jnp.float32)
    out = jax.block_until_ready(
        embedding_forward(x, weight, bias,
                          kernel_size=kernel_size, stride=stride, padding=padding))
    ref = _reference_forward(x, weight, bias, stride=stride, padding=padding)
    assert out.shape == ref.shape, (out.shape, ref.shape)
    np.testing.assert_allclose(np.asarray(out), np.asarray(ref), rtol=1e-5, atol=1e-5)

    # Case 2: multi-step grid exercising the Buffered(3) input pipeline and the ragged
    # (masked) final row tile.
    B2, L2 = 4, 6147
    x2 = jax.random.normal(k_x2, (B2, input_channel, L2), dtype=jnp.float32)
    out2 = jax.block_until_ready(
        embedding_forward(x2, weight, bias,
                          kernel_size=kernel_size, stride=stride, padding=padding))
    ref2 = _reference_forward(x2, weight, bias, stride=stride, padding=padding)
    assert out2.shape == ref2.shape, (out2.shape, ref2.shape)
    np.testing.assert_allclose(np.asarray(out2), np.asarray(ref2), rtol=1e-5, atol=1e-5)

    print("KERNEL_OK")
</pallas_src>

<mosaic_0001>
module attributes {stable_mosaic.version = 11 : i64} {
  func.func @_conv_embed_kernel(%arg0: i32, %arg1: memref<16x3xf32, #tpu.memory_space<vmem>>, %arg2: memref<3x50xf32, #tpu.memory_space<vmem>>, %arg3: memref<1x50xf32, #tpu.memory_space<vmem>>, %arg4: memref<16x50xf32, #tpu.memory_space<vmem>>) attributes {dimension_semantics = [#tpu.dimension_semantics<parallel>], iteration_bounds = array<i64: 1>, scalar_prefetch = 0 : i64, scratch_operands = 0 : i64, tpu.core_type = #tpu.core_type<tc>, window_params = [{transform_indices = @transform_0, window_bounds = array<i64: 16, 3>}, {pipeline_mode = #tpu.pipeline_mode<synchronous>, transform_indices = @transform_1, window_bounds = array<i64: 3, 50>}, {pipeline_mode = #tpu.pipeline_mode<synchronous>, transform_indices = @transform_2, window_bounds = array<i64: 1, 50>}, {transform_indices = @transform_3, window_bounds = array<i64: 16, 50>}]} {
    %c0 = arith.constant 0 : index
    %c0_0 = arith.constant 0 : index
    %0 = vector.load %arg1[%c0, %c0_0] : memref<16x3xf32, #tpu.memory_space<vmem>>, vector<16x3xf32>
    %c0_1 = arith.constant 0 : index
    %c0_2 = arith.constant 0 : index
    %1 = vector.load %arg2[%c0_1, %c0_2] : memref<3x50xf32, #tpu.memory_space<vmem>>, vector<3x50xf32>
    %cst = arith.constant dense<0.000000e+00> : vector<16x50xf32>
    %2 = tpu.matmul %0, %1, %cst {dimension_numbers = #tpu.dot_dimension_numbers<[1], [0], [0], [1], [0, 0, 1, 1], [], []>} : vector<16x3xf32>, vector<3x50xf32>, vector<16x50xf32> -> vector<16x50xf32>
    %c0_3 = arith.constant 0 : index
    %c0_4 = arith.constant 0 : index
    %3 = vector.load %arg3[%c0_3, %c0_4] : memref<1x50xf32, #tpu.memory_space<vmem>>, vector<1x50xf32>
    %4 = vector.broadcast %3 : vector<1x50xf32> to vector<16x50xf32>
    %5 = arith.addf %2, %4 : vector<16x50xf32>
    %cst_5 = arith.constant 0.000000e+00 : f32
    %6 = vector.broadcast %cst_5 : f32 to vector<16x50xf32>
    %7 = arith.maximumf %5, %6 : vector<16x50xf32>
    %c0_6 = arith.constant 0 : index
    %c0_7 = arith.constant 0 : index
    %8 = vector.load %arg4[%c0_6, %c0_7] : memref<16x50xf32, #tpu.memory_space<vmem>>, vector<16x50xf32>
    tpu.vector_store %arg4[%c0_6, %c0_7], %7 {strides = array<i32>} : memref<16x50xf32, #tpu.memory_space<vmem>>, vector<16x50xf32>,
    return
  }
  func.func @transform_0(%arg0: i32) -> (i32, i32) {
    %c0_i32 = arith.constant 0 : i32
    %c0_i32_0 = arith.constant 0 : i32
    return %arg0, %c0_i32 : i32, i32
  }
  func.func @transform_1(%arg0: i32) -> (i32, i32) {
    %c0_i32 = arith.constant 0 : i32
    %c0_i32_0 = arith.constant 0 : i32
    %c0_i32_1 = arith.constant 0 : i32
    return %c0_i32, %c0_i32_0 : i32, i32
  }
  func.func @transform_2(%arg0: i32) -> (i32, i32) {
    %c0_i32 = arith.constant 0 : i32
    %c0_i32_0 = arith.constant 0 : i32
    %c0_i32_1 = arith.constant 0 : i32
    return %c0_i32, %c0_i32_0 : i32, i32
  }
  func.func @transform_3(%arg0: i32) -> (i32, i32) {
    %c0_i32 = arith.constant 0 : i32
    %c0_i32_0 = arith.constant 0 : i32
    return %arg0, %c0_i32 : i32, i32
  }
}

</mosaic_0001>

<bundles_post_ra>
// kernel: tpu_custom_call.1
= control target key start
LH: loop header
LB: loop body
LE: loop exit
PB: predicated region body
PF: predicated region fallthrough
CT: control target
= control target key end

     0   :  { %vm32_vm0 = vcmask 1042432   ;;  %vm25_vm1 = vcmask 23552   ;;  %s207_s0 = inlined_call_operand.vmem [shape: f32[12,3], index: 0, kind: input, shape index: {}]   ;;  %s208_s1 = inlined_call_operand.vmem [shape: f32[3,50], index: 1, kind: input, shape index: {}]   ;;  %s209_s2 = inlined_call_operand.vmem [shape: f32[1,50], index: 2, kind: input, shape index: {}]   ;;  %s210_s3 = inlined_call_operand.hbm [shape: f32[12,50], index: 3, kind: output, shape index: {}]  }
   0x1   :  { %v17_v0 = vld [vmem:[%s208_s1] sm:$0x7]  ;;  %v16_v2 = vld [vmem:[%s207_s0 + $0x8] sm:$0xff] }
   0x2   :  { %v15_v1 = vld [vmem:[%s207_s0] sm:$0xff]  ;;  %139 = vmatprep.subr.msk.mxu0 %vm32_vm0, %v17_v0 }
   0x3   :  { %141 = vmatprep.mubr.msk.f32.mxu0 %vm25_vm1, %v15_v1 }
   0x4   :  { %8 = vsyncpa [#allocation3], 0  ;;  %140 = vmatpush3.msk.msra.mxu0 %vm32_vm0, %v17_v0  ;;  %v132_v3 = vld [vmem:[%s209_s2] ss:$0 sm:$0xff]  ;;  %s169_s1 = smov [#allocation2]   ;;  %vm113_vm2 = vcmask 408576  }
   0x5   :  { %142 = vmatmul.mubr.msk.f32.vlgmr.msra.gmra.mxu0 %vm25_vm1, %v16_v2  ;;  %s121_s20 = sshll.u32 %s169_s1, 4  ;;  %s122_s20 = int_to_ptr.vmem [resolvable:$true] %s121_s20 }
   0x6   :  { %s147_s0 = scalar_lea.vmem %s122_s20, 256  ;;  %p152_p1 = scmp.lt.s32.totalorder %s122_s20, %s122_s20 }
   0x7   :  { %p148_p0 = scmp.ne.s32.totalorder %s122_s20, %s147_s0  ;;  %p153_p2 = scmp.lt.s32.totalorder %s147_s0, %s147_s0 }
   0x9   :  { %p154_p3 = por %p153_p2, %p152_p1 }
   0xb   :  { %p155_p4 = pnand %p154_p3, %p148_p0 }
  0xc5   :  { %v143_v4 = vpop.f32.mrf.mxu0 }
  0xc6   :  { %v108_v5 = vadd.f32 %v143_v4, %v132_v3 }
  0xc7   :  { %v102_v6 = vpop.f32.mrf.mxu0 }
  0xc8   :  { %v112_v7 = vmax.f32 %v108_v5, 0.0  ;;  %v103_v8 = vadd.f32 %v132_v3, %v102_v6 }
  0xca   :  { %115 = vst.msk [vmem:[#allocation2 + $0x8] sm:$0xff] %vm113_vm2, %v112_v7  ;;  %v111_v9 = vmax.f32 %v103_v8, 0.0 }
  0xcc   :  { %114 = vst.msk [vmem:[#allocation2] sm:$0xff] %vm113_vm2, %v111_v9 }
  0xcd   :  { %158 = shalt.err (!%p155_p4)
}
  0xce   :  { %s170_s2 = smov 128   ;;  %s171_s21 = smov 8  }
  0xcf   :  { %127 = dma.vmem_to_hbm [thread:$0]  %s122_s20, 256, %s210_s3, [#allocation3], %s170_s2, %s170_s2, %s171_s21  }
  0xd0   :  { %167 = dma.done.wait [#allocation3], 256  }
  0xd1   :  { %168 = vsyncadd [#allocation3], 4294967040 }
  0xd2   :  { %131 = vsyncpa [#allocation3], 1 }

</bundles_post_ra>
